<compile_context>
chip_gen: v5e
topology: v5e:2x2
jax: 0.10.0
libtpu: 0.0.40
codegen_flags: <defaults>
</compile_context>

<pallas_src>
import random

import numpy as np
import jax
import jax.numpy as jnp
from jax.experimental import pallas as pl
from jax.experimental.pallas import tpu as pltpu

MU = 136.72353790613718
SIGMA = 62.34640414043511
MARGIN = 0.5  # TripletLoss_self(margin=0.5)

# Single-invocation path while the three f32 feature operands comfortably fit in VMEM
# on every generation (v7x scoped default = 32 MiB).
_SMALL_PATH_BYTES = 8 * 1024 * 1024


def _norm(x):
    return (x - MU) / SIGMA


# ----------------------------- Pallas kernels ---------------------------------
def _triplet_kernel_small(anchor_ref, near_ref, far_ref, malpha_ref, out_ref):
    """Single invocation: whole (B, D) operands resident in VMEM."""
    a = anchor_ref[...].astype(jnp.float32)
    dpn = a - near_ref[...].astype(jnp.float32)
    dfn = a - far_ref[...].astype(jnp.float32)
    # dp - dn fused into one cross-lane reduce: sum(dpn^2 - dfn^2).
    diff = jnp.sum(dpn * dpn - dfn * dfn, axis=1, keepdims=True)   # (B, 1)
    losses = jnp.maximum(diff + malpha_ref[...], 0.0)              # relu hinge
    out_ref[...] = jnp.sum(losses, axis=0, keepdims=True)          # (1, 1)


def _triplet_kernel_tiled(anchor_ref, near_ref, far_ref, malpha_ref, out_ref,
                          acc_ref):
    """Grid = (batch tiles ['parallel'], feature tiles ['arbitrary'])."""
    k = pl.program_id(1)

    @pl.when(k == 0)
    def _init():
        acc_ref[...] = jnp.zeros_like(acc_ref)

    # Lane-dense element-wise accumulation of (a-near)^2 - (a-far)^2: pure VALU work,
    # no XLU cross-lane reduce and no narrow-lane stores inside the reduction loop.
    a = anchor_ref[...].astype(jnp.float32)
    dpn = a - near_ref[...].astype(jnp.float32)
    dfn = a - far_ref[...].astype(jnp.float32)
    acc_ref[...] += dpn * dpn - dfn * dfn

    @pl.when(k == pl.num_programs(1) - 1)
    def _finalize():
        diff = jnp.sum(acc_ref[...], axis=1, keepdims=True)        # (tb, 1)
        out_ref[...] = jnp.maximum(diff + malpha_ref[...], 0.0)    # per-row losses


# ----------------------------- glue + wrapper ---------------------------------
def _prepare_triplets(features, labels, idx1, idx2):
    """Replicates the per-iteration near/far choice and the sequential in-place label
    normalization of the PyTorch loop (labels of indices < i were already normalized
    once when iteration i reads them, and get normalized again locally).  Returns the
    gathered near/far feature rows and the per-row margin*alpha term (O(B*L) work,
    hoisted out of the kernel)."""
    B = features.shape[0]
    i_arr = jnp.arange(B)

    lbl1 = labels[idx1]
    lbl2 = labels[idx2]
    eff1 = jnp.where((idx1 < i_arr)[:, None], _norm(lbl1), lbl1)
    eff2 = jnp.where((idx2 < i_arr)[:, None], _norm(lbl2), lbl2)

    # nn.L1Loss(reduction='sum') against the (still raw) anchor label
    d1 = jnp.sum(jnp.abs(labels - eff1), axis=1)
    d2 = jnp.sum(jnp.abs(labels - eff2), axis=1)
    cond = d1 >= d2  # True -> near is sample idx2, far is sample idx1

    near_idx = jnp.where(cond, idx2, idx1)
    far_idx = jnp.where(cond, idx1, idx2)

    a_lbl = _norm(labels)
    near_lbl = _norm(jnp.where(cond[:, None], eff2, eff1))
    far_lbl = _norm(jnp.where(cond[:, None], eff1, eff2))

    # alpha = d(anchor_label, far_label) - d(anchor_label, near_label); squared L2.
    alpha = (jnp.sum((a_lbl - far_lbl) ** 2, axis=1)
             - jnp.sum((a_lbl - near_lbl) ** 2, axis=1))
    malpha = (MARGIN * alpha)[:, None].astype(jnp.float32)          # (B, 1)

    # TODO(synk): for production-size B*D, avoid streaming 3x the feature matrix:
    # gather near/far rows in-kernel from scalar-prefetched near_idx/far_idx instead
    # of materializing gathered HBM copies in the wrapper.
    near_feat = features[near_idx]
    far_feat = features[far_idx]
    return near_feat, far_feat, malpha


def adaptive_triplet_loss_pallas(features, labels, idx1, idx2, *, td=None, tb=None):
    B, D = features.shape
    near_feat, far_feat, malpha = _prepare_triplets(features, labels, idx1, idx2)

    # --- small/medium path: one kernel invocation, no grid / scratch / branches.
    if (td is None and tb is None
            and 3 * B * D * features.dtype.itemsize <= _SMALL_PATH_BYTES):
        out = pl.pallas_call(
            _triplet_kernel_small,
            out_shape=jax.ShapeDtypeStruct((1, 1), jnp.float32),
        )(features, near_feat, far_feat, malpha)
        return out[0, 0]

    # --- tiled path for large D (and optionally tiled batch for megacore).
    if td is None:
        td = next((t for t in (512, 256, 128) if D % t == 0), D)
    if tb is None:
        tb = B
    assert D % td == 0, (D, td)
    assert B % tb == 0 and (tb == B or tb % 8 == 0), (B, tb)

    grid = (B // tb, D // td)
    feat_spec = pl.BlockSpec((tb, td), lambda b, k: (b, k))
    alpha_spec = pl.BlockSpec((tb, 1), lambda b, k: (b, 0))
    out_spec = pl.BlockSpec((tb, 1), lambda b, k: (b, 0))

    grid_spec = pltpu.PrefetchScalarGridSpec(
        num_scalar_prefetch=0,
        grid=grid,
        in_specs=[feat_spec, feat_spec, feat_spec, alpha_spec],
        out_specs=out_spec,
        scratch_shapes=[pltpu.VMEM((tb, td), jnp.float32)],
    )
    per_row = pl.pallas_call(
        _triplet_kernel_tiled,
        out_shape=jax.ShapeDtypeStruct((B, 1), jnp.float32),
        grid_spec=grid_spec,
        compiler_params=pltpu.CompilerParams(
            # batch tiles are independent -> "parallel" (sharded across TCs on v7x);
            # the feature axis is a reduction -> "arbitrary".
            dimension_semantics=("parallel", "arbitrary"),
            # raise the scoped-VMEM default (16 MiB v5e / 32 MiB v6e,v7x) so the
            # 3 double-buffered (tb, td) inputs + accumulator fit comfortably;
            # 48 MiB stays under v7x's 64 MiB physical VMEM.
            vmem_limit_bytes=48 * 1024 * 1024),
    )(features, near_feat, far_feat, malpha)
    return jnp.sum(per_row)


def adaptive_triplet_loss_ref(features, labels, idx1, idx2):
    near_feat, far_feat, malpha = _prepare_triplets(features, labels, idx1, idx2)
    dp = jnp.sum((features - near_feat) ** 2, axis=1)
    dn = jnp.sum((features - far_feat) ** 2, axis=1)
    losses = jnp.maximum(dp - dn + malpha[:, 0], 0.0)
    return jnp.sum(losses)


if __name__ == "__main__":
    B, D, L = 8, 256, 8

    key = jax.random.PRNGKey(0)
    kf, kl = jax.random.split(key)
    features = jax.random.normal(kf, (B, D), dtype=jnp.float32)
    # label values in the rough range implied by mu/sigma
    labels = jax.random.uniform(kl, (B, L), dtype=jnp.float32,
                                minval=50.0, maxval=250.0)

    # TODO(synk): random.sample-based triplet selection is inherently stochastic;
    # it is made deterministic here with a seeded Python RNG in glue.
    random.seed(0)
    idx1_list, idx2_list = [], []
    for i in range(B):
        i1, i2 = random.sample(range(B), 2)
        while i1 == i or i2 == i:
            i1, i2 = random.sample(range(B), 2)
        idx1_list.append(i1)
        idx2_list.append(i2)
    idx1 = jnp.asarray(idx1_list, dtype=jnp.int32)
    idx2 = jnp.asarray(idx2_list, dtype=jnp.int32)

    ref = jax.block_until_ready(
        adaptive_triplet_loss_ref(features, labels, idx1, idx2))

    # Small path (single invocation, no grid, no scratch).
    out_small = jax.block_until_ready(
        adaptive_triplet_loss_pallas(features, labels, idx1, idx2))
    # Tolerance accounts for the fused (dp - dn) accumulation order vs the XLA ref.
    np.testing.assert_allclose(np.asarray(out_small), np.asarray(ref),
                               rtol=1e-4, atol=1e-3)

    # Tiled path (exercised at small shapes too: grid = (1, 2), lane-dense accumulator).
    out_tiled = jax.block_until_ready(
        adaptive_triplet_loss_pallas(features, labels, idx1, idx2, td=128, tb=B))
    np.testing.assert_allclose(np.asarray(out_tiled), np.asarray(ref),
                               rtol=1e-4, atol=1e-3)

    print("KERNEL_OK")
</pallas_src>

<mosaic_0001>
module attributes {stable_mosaic.version = 11 : i64} {
  func.func @_triplet_kernel_small(%arg0: memref<8x256xf32, #tpu.memory_space<vmem>>, %arg1: memref<8x256xf32, #tpu.memory_space<vmem>>, %arg2: memref<8x256xf32, #tpu.memory_space<vmem>>, %arg3: memref<8x1xf32, #tpu.memory_space<vmem>>, %arg4: memref<1x1xf32, #tpu.memory_space<vmem>>) attributes {dimension_semantics = [], scalar_prefetch = 0 : i64, scratch_operands = 0 : i64, tpu.core_type = #tpu.core_type<tc>} {
    %c0 = arith.constant 0 : index
    %c0_0 = arith.constant 0 : index
    %0 = vector.load %arg0[%c0, %c0_0] : memref<8x256xf32, #tpu.memory_space<vmem>>, vector<8x256xf32>
    %c0_1 = arith.constant 0 : index
    %c0_2 = arith.constant 0 : index
    %1 = vector.load %arg1[%c0_1, %c0_2] : memref<8x256xf32, #tpu.memory_space<vmem>>, vector<8x256xf32>
    %2 = arith.subf %0, %1 : vector<8x256xf32>
    %c0_3 = arith.constant 0 : index
    %c0_4 = arith.constant 0 : index
    %3 = vector.load %arg2[%c0_3, %c0_4] : memref<8x256xf32, #tpu.memory_space<vmem>>, vector<8x256xf32>
    %4 = arith.subf %0, %3 : vector<8x256xf32>
    %5 = arith.mulf %2, %2 : vector<8x256xf32>
    %6 = arith.mulf %4, %4 : vector<8x256xf32>
    %7 = arith.subf %5, %6 : vector<8x256xf32>
    %cst = arith.constant dense<0.000000e+00> : vector<8xf32>
    %8 = vector.multi_reduction <add>, %7, %cst [1] : vector<8x256xf32> to vector<8xf32>
    %9 = vector.shape_cast %8 : vector<8xf32> to vector<8x1xf32>
    %c0_5 = arith.constant 0 : index
    %c0_6 = arith.constant 0 : index
    %10 = vector.load %arg3[%c0_5, %c0_6] : memref<8x1xf32, #tpu.memory_space<vmem>>, vector<8x1xf32>
    %11 = arith.addf %9, %10 : vector<8x1xf32>
    %cst_7 = arith.constant 0.000000e+00 : f32
    %12 = vector.broadcast %cst_7 : f32 to vector<8x1xf32>
    %13 = arith.maximumf %11, %12 : vector<8x1xf32>
    %cst_8 = arith.constant dense<0.000000e+00> : vector<1xf32>
    %14 = vector.multi_reduction <add>, %13, %cst_8 [0] : vector<8x1xf32> to vector<1xf32>
    %15 = vector.shape_cast %14 : vector<1xf32> to vector<1x1xf32>
    %c0_9 = arith.constant 0 : index
    %c0_10 = arith.constant 0 : index
    %16 = vector.load %arg4[%c0_9, %c0_10] : memref<1x1xf32, #tpu.memory_space<vmem>>, vector<1x1xf32>
    tpu.vector_store %arg4[%c0_9, %c0_10], %15 {strides = array<i32>} : memref<1x1xf32, #tpu.memory_space<vmem>>, vector<1x1xf32>,
    return
  }
}

</mosaic_0001>

<bundles_post_ra>
// kernel: tpu_custom_call.1
= control target key start
LH: loop header
LB: loop body
LE: loop exit
PB: predicated region body
PF: predicated region fallthrough
CT: control target
= control target key end

     0   :  { %9 = vsyncpa [#allocation3], 0  ;;  %s259_s0 = inlined_call_operand.hbm [shape: f32[8,256], index: 0, kind: input, shape index: {}]   ;;  %s260_s1 = inlined_call_operand.hbm [shape: f32[8,256], index: 1, kind: input, shape index: {}]   ;;  %s261_s2 = inlined_call_operand.hbm [shape: f32[8,256], index: 2, kind: input, shape index: {}]   ;;  %s262_s3 = inlined_call_operand.vmem [shape: f32[8,1], index: 3, kind: input, shape index: {}]   ;;  %s263_s4 = inlined_call_operand.hbm [shape: f32[1,1], index: 4, kind: output, shape index: {}]  }
   0x1   :  { %10 = vsyncpa [#allocation6], 0  ;;  %s28_s17 = sshll.u32 %s260_s1, 4  ;;  %s29_s17 = int_to_ptr.hbm [resolvable:$true] %s28_s17 }
   0x2   :  { %11 = vsyncpa [#allocation4], 0  ;;  %s215_s18 = smov [#allocation5]   ;;  %s17_s22 = sshll.u32 %s259_s0, 4  ;;  %s18_s22 = int_to_ptr.hbm [resolvable:$true] %s17_s22 }
   0x3   :  { %s30_s19 = sshll.u32 %s215_s18, 4  ;;  %s216_s23 = smov [#allocation2]   ;;  %s31_s19 = int_to_ptr.vmem [resolvable:$true] %s30_s19 }
   0x4   :  { %33 = dma.hbm_to_vmem [thread:$0]  %s29_s17, 256, %s31_s19, [#allocation6]  }
   0x5   :  { %s19_s24 = sshll.u32 %s216_s23, 4  ;;  %s39_s27 = sshll.u32 %s261_s2, 4  ;;  %s20_s24 = int_to_ptr.vmem [resolvable:$true] %s19_s24  ;;  %s40_s27 = int_to_ptr.hbm [resolvable:$true] %s39_s27 }
   0x6   :  { %22 = dma.hbm_to_vmem [thread:$0]  %s18_s22, 256, %s20_s24, [#allocation3]  }
   0x7   :  { %s217_s1 = smov [#allocation7]  }
   0x8   :  { %s41_s28 = sshll.u32 %s217_s1, 4  ;;  %s42_s28 = int_to_ptr.vmem [resolvable:$true] %s41_s28 }
   0x9   :  { %44 = dma.hbm_to_vmem [thread:$0]  %s40_s27, 256, %s42_s28, [#allocation6]  }
   0xa   :  { %209 = dma.done.wait [#allocation3], 256  }
   0xb   :  { %210 = vsyncadd [#allocation3], 4294967040 }
   0xc   :  { %211 = dma.done.wait [#allocation6], 512  }
   0xd   :  { %212 = vsyncadd [#allocation6], 4294966784  ;;  %v59_v0 = vld [vmem:[#allocation2] sm:$0xff]  ;;  %v60_v1 = vld [vmem:[#allocation2 + $0x8] sm:$0xff]  ;;  %vm81_vm0 = vcmask 7168   ;;  %s218_s29 = smov [#allocation8]  }
   0xe   :  { %v61_v2 = vld [vmem:[#allocation5] sm:$0xff]  ;;  %v62_v3 = vld [vmem:[#allocation5 + $0x8] sm:$0xff]  ;;  %v65_v5 = vld [vmem:[#allocation7] sm:$0xff]  ;;  %s96_s30 = sshll.u32 %s218_s29, 4  ;;  %s98_s7 = sshll.u32 %s263_s4, 4  ;;  %vm89_vm1 = vcmask 0   ;;  %s97_s30 = int_to_ptr.vmem [resolvable:$true] %s96_s30  ;;  %s99_s7 = int_to_ptr.hbm [resolvable:$true] %s98_s7 }
   0xf   :  { %v63_v4 = vsub.f32 %v59_v0, %v61_v2  ;;  %v66_v6 = vld [vmem:[#allocation7 + $0x8] sm:$0xff]  ;;  %v64_v7 = vsub.f32 %v60_v1, %v62_v3  ;;  %v67_v8 = vsub.f32 %v59_v0, %v65_v5  ;;  %v78_v17 = vld [vmem:[%s262_s3] sm:$0xff] }
  0x10   :  { %v68_v9 = vsub.f32 %v60_v1, %v66_v6 }
  0x11   :  { %v69_v10 = vmul.f32 %v63_v4, %v63_v4  ;;  %v70_v11 = vmul.f32 %v64_v7, %v64_v7  ;;  %v71_v12 = vmul.f32 %v67_v8, %v67_v8 }
  0x12   :  { %v72_v13 = vmul.f32 %v68_v9, %v68_v9 }
  0x13   :  { %v73_v14 = vsub.f32 %v69_v10, %v71_v12 }
  0x14   :  { %v74_v15 = vsub.f32 %v70_v11, %v72_v13 }
  0x16   :  { %v75_v16 = vadd.f32 %v74_v15, %v73_v14 }
  0x18   :  { %76 = vadd.xlane.f32.xlu0 %v75_v16 }
  0x8b   :  { %v77_v18 = vpop.xlane.xlu0 %76 }
  0x8c   :  { %v79_v19 = vadd.f32 %v78_v17, %v77_v18 }
  0x8e   :  { %v80_v20 = vmax.f32 %v79_v19, 0.0 }
  0x90   :  { %v82_v21 = vsel %vm81_vm0, %v80_v20, 0.0 }
  0x91   :  { %v83_v22 = vrot.slane %v82_v21, 4 }
  0x93   :  { %v84_v23 = vadd.f32 %v83_v22, %v82_v21 }
  0x95   :  { %v85_v24 = vrot.slane %v84_v23, 2 }
  0x97   :  { %v86_v25 = vadd.f32 %v85_v24, %v84_v23 }
  0x99   :  { %v87_v26 = vrot.slane %v86_v25, 1 }
  0x9b   :  { %v88_v27 = vadd.f32 %v87_v26, %v86_v25 }
  0x9d   :  { %90 = vst.msk [vmem:[#allocation8] sm:$0x1] %vm89_vm1, %v88_v27 }
  0x9e   :  { %101 = dma.vmem_to_hbm [thread:$0]  %s97_s30, 16, %s99_s7, [#allocation4]  }
  0x9f   :  { %213 = dma.done.wait [#allocation4], 16  }
  0xa0   :  { %214 = vsyncadd [#allocation4], 4294967280 }
  0xa1   :  { %106 = vsyncpa [#allocation3], 1 }
  0xa2   :  { %107 = vsyncpa [#allocation6], 1 }
  0xa3   :  { %108 = vsyncpa [#allocation4], 1 }

</bundles_post_ra>
